<compile_context>
chip_gen: v7x
topology: tpu7x:2x2x1
jax: 0.10.0
libtpu: 0.0.40
codegen_flags: <defaults>
</compile_context>

<pallas_src>
import jax
import jax.numpy as jnp
from jax.experimental import pallas as pl
from jax.experimental.pallas import tpu as pltpu


def _autoencoder_loss_kernel(x_ref, w1_ref, b1_ref, w2_ref, b2_ref, part_ref):
    # x_ref   : (TB, D)     f32   batch tile (double-buffered / pipelined)
    # w1_ref  : (D, HID_P)  bf16  VMEM-resident (constant block, single-buffered)
    # b1_ref  : (1, HID_P)  f32
    # w2_ref  : (HID_P, D)  bf16
    # b2_ref  : (1, D)      f32
    # part_ref: (8, D)      f32   lane-dense per-grid-step partial SSE
    x = x_ref[...]                                          # f32, kept for the residual

    # encoder: Linear + ReLU (bf16 MXU operands, f32 accumulation)
    z = jnp.dot(x.astype(jnp.bfloat16), w1_ref[...],
                preferred_element_type=jnp.float32) + b1_ref[...]
    z = jnp.maximum(z, 0.0)

    # decoder: Linear + Sigmoid (bf16 MXU operands; single EUP logistic)
    y = jnp.dot(z.astype(jnp.bfloat16), w2_ref[...],
                preferred_element_type=jnp.float32) + b2_ref[...]
    y = jax.nn.sigmoid(y)

    # Squared reconstruction error in f32. Reduce the batch-tile rows down to
    # 8 sublanes with static, tile-aligned slices (VPU adds only, no reshape /
    # relayout). The scalar mean is finished outside the kernel.
    diff = x - y
    sq = diff * diff                                        # (TB, D) f32
    tb, d = sq.shape
    if tb % 8 != 0:                                         # tiny-batch fallback (static)
        sq = jnp.concatenate(
            [sq, jnp.zeros((8 - tb % 8, d), sq.dtype)], axis=0)
        tb = sq.shape[0]
    acc = sq[0:8, :]
    for r in range(1, tb // 8):                             # static, tile-aligned slices
        acc = acc + sq[r * 8:(r + 1) * 8, :]
    part_ref[...] = acc                                     # (8, D) unmasked lane-dense store


def _pick_batch_tile(batch, d, hid_p, vmem_budget_bytes):
    """Largest batch tile that (a) divides batch, (b) keeps nblk >= 2 so the x
    pipeline/double-buffering actually overlaps, and (c) fits the VMEM budget
    (sized for v7x's 64 MiB as the tightest chip)."""
    weight_bytes = 2 * (d * hid_p + hid_p * d)        # bf16, single-buffered
    bias_bytes = 4 * (hid_p + d)
    out_bytes = 2 * 8 * d * 4                         # double-buffered output block

    def fits(tb):
        x_bytes = 2 * tb * d * 4                      # double-buffered f32 input tile
        interm = 4 * tb * d * 4 + 2 * tb * hid_p * 4  # y/diff/sq/acc + z headroom
        return (weight_bytes + bias_bytes + out_bytes + x_bytes + interm
                <= vmem_budget_bytes)

    for tb in (1024, 512, 256, 128, 64, 32, 16, 8):
        if batch % tb == 0 and batch // tb >= 2 and fits(tb):
            return tb
    # TODO(synk): for large batches not divisible by 8, pad+mask the batch dim
    # instead of falling back to a single full-array tile.
    return batch


def autoencoder_mse_loss(img_nchw, w1, b1, w2, b2, *, tile_b=None):
    """img_nchw: (B, C, H, W) f32. Returns scalar MSE reconstruction loss."""
    B = img_nchw.shape[0]
    D = img_nchw.shape[1] * img_nchw.shape[2] * img_nchw.shape[3]
    HID = w1.shape[1]
    # TODO(synk): if D is ever not a multiple of 128 (e.g. flattened 784), pad
    # the lane dim and mask the padded columns out of the SSE reduction.
    assert D % 128 == 0, "flattened image dim must be a multiple of 128"

    x = img_nchw.reshape(B, D).astype(jnp.float32)

    # Pad HID up to a multiple of 128 so both matmuls are full MXU tiles.
    # Exact: ReLU(x@0 + 0) = 0 and the corresponding zero rows of w2 add 0.
    HID_P = ((HID + 127) // 128) * 128
    w1_p = jnp.zeros((D, HID_P), jnp.bfloat16).at[:, :HID].set(w1.astype(jnp.bfloat16))
    b1_p = jnp.zeros((1, HID_P), jnp.float32).at[:, :HID].set(
        b1.reshape(1, HID).astype(jnp.float32))
    w2_p = jnp.zeros((HID_P, D), jnp.bfloat16).at[:HID, :].set(w2.astype(jnp.bfloat16))
    b2_p = b2.reshape(1, D).astype(jnp.float32)

    VMEM_BUDGET = 40 * 1024 * 1024                    # fits v7x's 64 MiB with headroom
    TB = _pick_batch_tile(B, D, HID_P, VMEM_BUDGET) if tile_b is None else tile_b
    assert B % TB == 0, "batch must be divisible by the batch tile"
    nblk = B // TB

    cost = pl.CostEstimate(
        flops=4 * B * D * HID_P + 6 * B * D,          # two matmuls + elementwise
        transcendentals=B * D,                        # one logistic per output element
        bytes_accessed=(4 * B * D                     # x (f32)
                        + 2 * 2 * D * HID_P           # bf16 weights
                        + 4 * (HID_P + D)             # biases
                        + 4 * nblk * 8 * D),          # partial-SSE output
    )

    weight_mode = pl.Buffered(1)                      # constant blocks: no 2nd buffer
    partials = pl.pallas_call(
        _autoencoder_loss_kernel,
        out_shape=jax.ShapeDtypeStruct((nblk * 8, D), jnp.float32),
        grid_spec=pltpu.PrefetchScalarGridSpec(
            num_scalar_prefetch=0,
            grid=(nblk,),
            in_specs=[
                pl.BlockSpec((TB, D), lambda i: (i, 0)),      # x: pipelined batch tile
                pl.BlockSpec((D, HID_P), lambda i: (0, 0), pipeline_mode=weight_mode),
                pl.BlockSpec((1, HID_P), lambda i: (0, 0), pipeline_mode=weight_mode),
                pl.BlockSpec((HID_P, D), lambda i: (0, 0), pipeline_mode=weight_mode),
                pl.BlockSpec((1, D), lambda i: (0, 0), pipeline_mode=weight_mode),
            ],
            out_specs=pl.BlockSpec((8, D), lambda i: (i, 0)),
        ),
        compiler_params=pltpu.CompilerParams(
            # Independent per-tile partials -> safe for megacore sharding.
            # TODO(synk): on v7x, verify both TCs are used; if not, switch to
            # pltpu.CORE_PARALLEL and keep nblk a multiple of 2.
            dimension_semantics=("parallel",),
            vmem_limit_bytes=48 * 1024 * 1024,        # above 16/32 MiB scoped defaults
        ),
        cost_estimate=cost,
    )(x, w1_p, b1_p, w2_p, b2_p)

    # Finish nn.MSELoss: mean over all elements (tiny reduce + constant multiply).
    inv_n = 1.0 / float(B * D)
    return jnp.sum(partials) * inv_n


def _init_params(key, d_in, d_hidden):
    # Deterministic PyTorch-style Linear init: U(-1/sqrt(fan_in), 1/sqrt(fan_in))
    k1, k2, k3, k4 = jax.random.split(key, 4)
    s1 = 1.0 / jnp.sqrt(jnp.float32(d_in))
    s2 = 1.0 / jnp.sqrt(jnp.float32(d_hidden))
    w1 = jax.random.uniform(k1, (d_in, d_hidden), jnp.float32, -s1, s1)
    b1 = jax.random.uniform(k2, (d_hidden,), jnp.float32, -s1, s1)
    w2 = jax.random.uniform(k3, (d_hidden, d_in), jnp.float32, -s2, s2)
    b2 = jax.random.uniform(k4, (d_in,), jnp.float32, -s2, s2)
    return w1, b1, w2, b2


if __name__ == "__main__":
    key = jax.random.PRNGKey(0)
    k_img, k_par, k_img2 = jax.random.split(key, 3)

    # Small shapes consistent with the forward: batch=2, channels=4, spatial=16
    B, C, IH, IW = 2, 4, 16, 16
    HIDDEN = 32
    D = C * IH * IW

    img = jax.random.uniform(k_img, (B, C, IH, IW), jnp.float32)  # NCHW like PyTorch
    w1, b1, w2, b2 = _init_params(k_par, D, HIDDEN)

    def ref_loss(img_nchw):
        # Reference mirrors the kernel's numerics (bf16 MXU operands, f32
        # accumulation, f32 residual) so tight tolerances are meaningful.
        x = img_nchw.reshape(img_nchw.shape[0], -1).astype(jnp.float32)
        z = jnp.maximum(
            jnp.dot(x.astype(jnp.bfloat16), w1.astype(jnp.bfloat16),
                    preferred_element_type=jnp.float32) + b1, 0.0)
        y = jax.nn.sigmoid(
            jnp.dot(z.astype(jnp.bfloat16), w2.astype(jnp.bfloat16),
                    preferred_element_type=jnp.float32) + b2)
        return jnp.mean((x - y) ** 2)

    # Tiny-batch path (grid == 1, full-array tile, sublane padding fallback).
    loss = autoencoder_mse_loss(img, w1, b1, w2, b2)
    jax.block_until_ready(loss)
    assert jnp.allclose(loss, ref_loss(img), rtol=1e-4, atol=1e-6), (
        loss, ref_loss(img))

    # Batch-gridded path (auto picker -> TB=32, nblk=2: pipelined x tiles,
    # VMEM-resident single-buffered weights, multi-group sublane accumulation).
    img_big = jax.random.uniform(k_img2, (64, C, IH, IW), jnp.float32)
    loss_big = autoencoder_mse_loss(img_big, w1, b1, w2, b2)
    jax.block_until_ready(loss_big)
    assert jnp.allclose(loss_big, ref_loss(img_big), rtol=1e-4, atol=1e-6), (
        loss_big, ref_loss(img_big))

    # Explicit-tile path (TB=8, nblk=8) to exercise deeper grids.
    loss_t8 = autoencoder_mse_loss(img_big, w1, b1, w2, b2, tile_b=8)
    jax.block_until_ready(loss_t8)
    assert jnp.allclose(loss_t8, ref_loss(img_big), rtol=1e-4, atol=1e-6), (
        loss_t8, ref_loss(img_big))

    print("KERNEL_OK")
</pallas_src>

<mosaic_0001>
module attributes {stable_mosaic.version = 11 : i64} {
  func.func @_autoencoder_loss_kernel(%arg0: i32, %arg1: memref<2x1024xf32, #tpu.memory_space<vmem>>, %arg2: memref<1024x128xbf16, #tpu.memory_space<vmem>>, %arg3: memref<1x128xf32, #tpu.memory_space<vmem>>, %arg4: memref<128x1024xbf16, #tpu.memory_space<vmem>>, %arg5: memref<1x1024xf32, #tpu.memory_space<vmem>>, %arg6: memref<8x1024xf32, #tpu.memory_space<vmem>>) attributes {dimension_semantics = [#tpu.dimension_semantics<parallel>], iteration_bounds = array<i64: 1>, scalar_prefetch = 0 : i64, scratch_operands = 0 : i64, tpu.core_type = #tpu.core_type<tc>, window_params = [{transform_indices = @transform_0, window_bounds = array<i64: 2, 1024>}, {pipeline_mode = #tpu.pipeline_mode<synchronous>, transform_indices = @transform_1, window_bounds = array<i64: 1024, 128>}, {pipeline_mode = #tpu.pipeline_mode<synchronous>, transform_indices = @transform_2, window_bounds = array<i64: 1, 128>}, {pipeline_mode = #tpu.pipeline_mode<synchronous>, transform_indices = @transform_3, window_bounds = array<i64: 128, 1024>}, {pipeline_mode = #tpu.pipeline_mode<synchronous>, transform_indices = @transform_4, window_bounds = array<i64: 1, 1024>}, {transform_indices = @transform_5, window_bounds = array<i64: 8, 1024>}]} {
    %c0 = arith.constant 0 : index
    %c0_0 = arith.constant 0 : index
    %0 = vector.load %arg1[%c0, %c0_0] : memref<2x1024xf32, #tpu.memory_space<vmem>>, vector<2x1024xf32>
    %1 = arith.truncf %0 : vector<2x1024xf32> to vector<2x1024xbf16>
    %c0_1 = arith.constant 0 : index
    %c0_2 = arith.constant 0 : index
    %2 = vector.load %arg2[%c0_1, %c0_2] : memref<1024x128xbf16, #tpu.memory_space<vmem>>, vector<1024x128xbf16>
    %cst = arith.constant dense<0.000000e+00> : vector<2x128xf32>
    %3 = tpu.matmul %1, %2, %cst {dimension_numbers = #tpu.dot_dimension_numbers<[1], [0], [0], [1], [0, 0, 1, 1], [], []>} : vector<2x1024xbf16>, vector<1024x128xbf16>, vector<2x128xf32> -> vector<2x128xf32>
    %c0_3 = arith.constant 0 : index
    %c0_4 = arith.constant 0 : index
    %4 = vector.load %arg3[%c0_3, %c0_4] : memref<1x128xf32, #tpu.memory_space<vmem>>, vector<1x128xf32>
    %5 = vector.broadcast %4 : vector<1x128xf32> to vector<2x128xf32>
    %6 = arith.addf %3, %5 : vector<2x128xf32>
    %cst_5 = arith.constant 0.000000e+00 : f32
    %7 = vector.broadcast %cst_5 : f32 to vector<2x128xf32>
    %8 = arith.maximumf %6, %7 : vector<2x128xf32>
    %9 = arith.truncf %8 : vector<2x128xf32> to vector<2x128xbf16>
    %c0_6 = arith.constant 0 : index
    %c0_7 = arith.constant 0 : index
    %10 = vector.load %arg4[%c0_6, %c0_7] : memref<128x1024xbf16, #tpu.memory_space<vmem>>, vector<128x1024xbf16>
    %cst_8 = arith.constant dense<0.000000e+00> : vector<2x1024xf32>
    %11 = tpu.matmul %9, %10, %cst_8 {dimension_numbers = #tpu.dot_dimension_numbers<[1], [0], [0], [1], [0, 0, 1, 1], [], []>} : vector<2x128xbf16>, vector<128x1024xbf16>, vector<2x1024xf32> -> vector<2x1024xf32>
    %c0_9 = arith.constant 0 : index
    %c0_10 = arith.constant 0 : index
    %12 = vector.load %arg5[%c0_9, %c0_10] : memref<1x1024xf32, #tpu.memory_space<vmem>>, vector<1x1024xf32>
    %13 = vector.broadcast %12 : vector<1x1024xf32> to vector<2x1024xf32>
    %14 = arith.addf %11, %13 : vector<2x1024xf32>
    %15 = arith.negf %14 : vector<2x1024xf32>
    %16 = math.exp %15 : vector<2x1024xf32>
    %cst_11 = arith.constant 1.000000e+00 : f32
    %17 = vector.broadcast %cst_11 : f32 to vector<2x1024xf32>
    %18 = arith.addf %17, %16 : vector<2x1024xf32>
    %19 = arith.divf %17, %18 : vector<2x1024xf32>
    %20 = arith.subf %0, %19 : vector<2x1024xf32>
    %21 = arith.mulf %20, %20 : vector<2x1024xf32>
    %cst_12 = arith.constant 0.000000e+00 : f32
    %22 = vector.broadcast %cst_12 : f32 to vector<6x1024xf32>
    %23 = tpu.concatenate %21, %22 in 0 : vector<2x1024xf32>, vector<6x1024xf32> -> vector<8x1024xf32>
    %c0_13 = arith.constant 0 : index
    %c0_14 = arith.constant 0 : index
    %24 = vector.load %arg6[%c0_13, %c0_14] : memref<8x1024xf32, #tpu.memory_space<vmem>>, vector<8x1024xf32>
    tpu.vector_store %arg6[%c0_13, %c0_14], %23 {strides = array<i32>} : memref<8x1024xf32, #tpu.memory_space<vmem>>, vector<8x1024xf32>,
    return
  }
  func.func @transform_0(%arg0: i32) -> (i32, i32) {
    %c0_i32 = arith.constant 0 : i32
    %c0_i32_0 = arith.constant 0 : i32
    return %arg0, %c0_i32 : i32, i32
  }
  func.func @transform_1(%arg0: i32) -> (i32, i32) {
    %c0_i32 = arith.constant 0 : i32
    %c0_i32_0 = arith.constant 0 : i32
    %c0_i32_1 = arith.constant 0 : i32
    return %c0_i32, %c0_i32_0 : i32, i32
  }
  func.func @transform_2(%arg0: i32) -> (i32, i32) {
    %c0_i32 = arith.constant 0 : i32
    %c0_i32_0 = arith.constant 0 : i32
    %c0_i32_1 = arith.constant 0 : i32
    return %c0_i32, %c0_i32_0 : i32, i32
  }
  func.func @transform_3(%arg0: i32) -> (i32, i32) {
    %c0_i32 = arith.constant 0 : i32
    %c0_i32_0 = arith.constant 0 : i32
    %c0_i32_1 = arith.constant 0 : i32
    return %c0_i32, %c0_i32_0 : i32, i32
  }
  func.func @transform_4(%arg0: i32) -> (i32, i32) {
    %c0_i32 = arith.constant 0 : i32
    %c0_i32_0 = arith.constant 0 : i32
    %c0_i32_1 = arith.constant 0 : i32
    return %c0_i32, %c0_i32_0 : i32, i32
  }
  func.func @transform_5(%arg0: i32) -> (i32, i32) {
    %c0_i32 = arith.constant 0 : i32
    %c0_i32_0 = arith.constant 0 : i32
    return %arg0, %c0_i32 : i32, i32
  }
}

</mosaic_0001>

<bundles_post_ra>
// kernel: tpu_custom_call.1
= control target key start
LH: loop header
LB: loop body
LE: loop exit
PB: predicated region body
PF: predicated region fallthrough
CT: control target
= control target key end

     0   :  { %10 = vsyncpa [#allocation3], 0  ;;  %s2131_s0 = inlined_call_operand.hbm [shape: f32[2,1024], index: 0, kind: input, shape index: {}]   ;;  %s2132_s1 = inlined_call_operand.hbm [shape: bf16[1024,128], index: 1, kind: input, shape index: {}]   ;;  %s2133_s2 = inlined_call_operand.vmem [shape: f32[1,128], index: 2, kind: input, shape index: {}]   ;;  %s2134_s3 = inlined_call_operand.hbm [shape: bf16[128,1024], index: 3, kind: input, shape index: {}]   ;;  %s2135_s4 = inlined_call_operand.vmem [shape: f32[1,1024], index: 4, kind: input, shape index: {}]   ;;  %s2136_s5 = inlined_call_operand.hbm [shape: f32[8,1024], index: 5, kind: output, shape index: {}]  }
   0x1   :  { %11 = vsyncpa [#allocation6], 0 }
   0x2   :  { %12 = vsyncpa [#allocation4], 0  ;;  %s1986_s18 = smov [#allocation5]   ;;  %s1892_s22 = scalar_lea.hbm %s2132_s1, 8192 }
   0x3   :  { %s28_s19 = sshll.u32 %s1986_s18, 4  ;;  %p1893_p0 = scmp.ne.s32.totalorder %s2132_s1, %s1892_s22  ;;  %s29_s19 = int_to_ptr.vmem [resolvable:$true] %s28_s19 }
   0x4   :  { %p1896_p1 = scmp.lt.u32.totalorder %s1892_s22, %s2132_s1 }
   0x6   :  { %p1898_p2 = pnand %p1896_p1, %p1893_p0 }
   0x8   :  { %1901 = shalt.err (!%p1898_p2)
}
   0x9   :  { %s1902_s27 = scalar_lea.vmem %s29_s19, 8192  ;;  %p1907_p4 = scmp.lt.s32.totalorder %s29_s19, %s29_s19 }
   0xa   :  { %p1903_p3 = scmp.ne.s32.totalorder %s29_s19, %s1902_s27  ;;  %p1908_p5 = scmp.lt.s32.totalorder %s1902_s27, %s1902_s27 }
   0xc   :  { %p1909_p6 = por %p1908_p5, %p1907_p4 }
   0xe   :  { %p1910_p7 = pnand %p1909_p6, %p1903_p3 }
  0x10   :  { %1913 = shalt.err (!%p1910_p7)
}
  0x11   :  { %s1987_s28 = smov 64   ;;  %s1988_s29 = smov 4  }
  0x12   :  { %34 = dma.hbm_to_vmem [thread:$0]  %s2132_s1, 8192, %s29_s19, [#allocation6], %s1987_s28, %s1987_s28, %s1988_s29  }
  0x13   :  { %s1989_s7 = smov [#allocation2]   ;;  %s1990_s9 = smov [#allocation7]  }
  0x14   :  { %s19_s8 = sshll.u32 %s1989_s7, 4  ;;  %s42_s10 = sshll.u32 %s1990_s9, 4  ;;  %s20_s8 = int_to_ptr.vmem [resolvable:$true] %s19_s8  ;;  %s43_s10 = int_to_ptr.vmem [resolvable:$true] %s42_s10 }
  0x15   :  { %s1914_s13 = scalar_lea.hbm %s2131_s0, 256 }
  0x16   :  { %p1915_p8 = scmp.ne.s32.totalorder %s2131_s0, %s1914_s13  ;;  %p1918_p9 = scmp.lt.u32.totalorder %s1914_s13, %s2131_s0 }
  0x18   :  { %p1920_p10 = pnand %p1918_p9, %p1915_p8 }
  0x1a   :  { %1923 = shalt.err (!%p1920_p10)
}
  0x1b   :  { %s1924_s1 = scalar_lea.vmem %s20_s8, 256  ;;  %p1929_p12 = scmp.lt.s32.totalorder %s20_s8, %s20_s8 }
  0x1c   :  { %p1925_p11 = scmp.ne.s32.totalorder %s20_s8, %s1924_s1  ;;  %p1930_p13 = scmp.lt.s32.totalorder %s1924_s1, %s1924_s1 }
  0x1e   :  { %p1931_p0 = por %p1930_p13, %p1929_p12 }
  0x20   :  { %p1932_p1 = pnand %p1931_p0, %p1925_p11 }
  0x22   :  { %1935 = shalt.err (!%p1932_p1)
}
  0x23   :  { %22 = dma.hbm_to_vmem [thread:$0]  %s2131_s0, 256, %s20_s8, [#allocation3]  }
  0x24   :  { %s1936_s22 = scalar_lea.hbm %s2134_s3, 8192 }
  0x25   :  { %p1937_p2 = scmp.ne.s32.totalorder %s2134_s3, %s1936_s22  ;;  %p1940_p3 = scmp.lt.u32.totalorder %s1936_s22, %s2134_s3 }
  0x27   :  { %p1942_p4 = pnand %p1940_p3, %p1937_p2 }
  0x29   :  { %1945 = shalt.err (!%p1942_p4)
}
  0x2a   :  { %s1946_s27 = scalar_lea.vmem %s43_s10, 8192  ;;  %p1951_p6 = scmp.lt.s32.totalorder %s43_s10, %s43_s10 }
  0x2b   :  { %p1947_p5 = scmp.ne.s32.totalorder %s43_s10, %s1946_s27  ;;  %p1952_p7 = scmp.lt.s32.totalorder %s1946_s27, %s1946_s27 }
  0x2d   :  { %p1953_p8 = por %p1952_p7, %p1951_p6 }
  0x2f   :  { %p1954_p9 = pnand %p1953_p8, %p1947_p5 }
  0x31   :  { %1957 = shalt.err (!%p1954_p9)
}
  0x32   :  { %s1991_s0 = smov 512   ;;  %s1992_s28 = smov 32  }
  0x33   :  { %48 = dma.hbm_to_vmem [thread:$0]  %s2134_s3, 8192, %s43_s10, [#allocation6], %s1991_s0, %s1991_s0, %s1992_s28  }
  0x34   :  { %1980 = dma.done.wait [#allocation3], 256  }
  0x35   :  { %1981 = vsyncadd [#allocation3], 4294967040 }
  0x36   :  { %1982 = dma.done.wait [#allocation6], 16384  }
  0x37   :  { %1983 = vsyncadd [#allocation6], 4294950912  ;;  %v1794_v0 = vld [vmem:[#allocation5 + $0x40] sm:$0xff]   ;;  %v1798_v4 = vld [vmem:[#allocation5 + $0x48] sm:$0xff]   ;;  %v1993_v22 = vmov 1983009808   ;;  %v69_v24 = vlaneseq }
  0x38   :  { %v1795_v1 = vld [vmem:[#allocation5 + $0xc0] sm:$0xff]   ;;  %1696 = vmatprep.subr.bf16.mxu0 %v1794_v0  ;;  %v1799_v5 = vld [vmem:[#allocation5 + $0xc8] sm:$0xff]   ;;  %v1802_v8 = vld [vmem:[#allocation5 + $0x50] sm:$0xff]   ;;  %v67_v23 = vunpack.c.l.s4 %v1993_v22  ;;  %vm1526_vm0 = vcmask 1041408  }
  0x39   :  { %v1796_v2 = vld [vmem:[#allocation5] sm:$0xff]   ;;  %1718 = vmatprep.subr.bf16.mxu1 %v1795_v1  ;;  %v1800_v6 = vld [vmem:[#allocation5 + $0x8] sm:$0xff]   ;;  %v1803_v9 = vld [vmem:[#allocation5 + $0xd0] sm:$0xff]   ;;  %v2062_v30 = vshrl.u32 %v69_v24, 7 }
  0x3a   :  { %v1797_v3 = vld [vmem:[#allocation5 + $0x80] sm:$0xff]   ;;  %1697 = vmatpush3.bf16.msra.mxu0 %v1796_v2  ;;  %v1801_v7 = vld [vmem:[#allocation5 + $0x88] sm:$0xff]   ;;  %v1804_v10 = vld [vmem:[#allocation5 + $0x10] sm:$0xff]   ;;  %v68_v29 = vunpack.c.0.s8 %v67_v23 }
  0x3b   :  { %1719 = vmatpush3.bf16.msra.mxu1 %v1797_v3  ;;  %1698 = vmatprep.subr.bf16.mxu0 %v1798_v4  ;;  %v1805_v11 = vld [vmem:[#allocation5 + $0x90] sm:$0xff]   ;;  %v1806_v12 = vld [vmem:[#allocation5 + $0x58] sm:$0xff]   ;;  %v1810_v16 = vld [vmem:[#allocation5 + $0x60] sm:$0xff]  }
  0x3c   :  { %1720 = vmatprep.subr.bf16.mxu1 %v1799_v5  ;;  %v1807_v13 = vld [vmem:[#allocation5 + $0xd8] sm:$0xff]   ;;  %v1811_v17 = vld [vmem:[#allocation5 + $0xe0] sm:$0xff]   ;;  %v1814_v20 = vld [vmem:[#allocation5 + $0x68] sm:$0xff]   ;;  %v2065_v35 = vsub.s32 %v68_v29, %v2062_v30 }
  0x3d   :  { %v1808_v14 = vld [vmem:[#allocation5 + $0x18] sm:$0xff]   ;;  %v1812_v18 = vld [vmem:[#allocation5 + $0x20] sm:$0xff]   ;;  %v1815_v21 = vld [vmem:[#allocation5 + $0xe8] sm:$0xff]  }
  0x3e   :  { %1699 = vmatpush3.bf16.msra.mxu0 %v1800_v6  ;;  %v1809_v15 = vld [vmem:[#allocation5 + $0x98] sm:$0xff]   ;;  %v1813_v19 = vld [vmem:[#allocation5 + $0xa0] sm:$0xff]   ;;  %v1816_v25 = vld [vmem:[#allocation5 + $0x28] sm:$0xff]  }
  0x3f   :  { %1721 = vmatpush3.bf16.msra.mxu1 %v1801_v7  ;;  %1700 = vmatprep.subr.bf16.mxu0 %v1802_v8  ;;  %v1817_v26 = vld [vmem:[#allocation5 + $0xa8] sm:$0xff]   ;;  %v1818_v27 = vld [vmem:[#allocation5 + $0x70] sm:$0xff]   ;;  %v1822_v33 = vld [vmem:[#allocation5 + $0x78] sm:$0xff]  }
  0x40   :  { %1722 = vmatprep.subr.bf16.mxu1 %v1803_v9  ;;  %v1819_v28 = vld [vmem:[#allocation5 + $0xf0] sm:$0xff]   ;;  %v1823_v34 = vld [vmem:[#allocation5 + $0xf8] sm:$0xff]   ;;  %v1827_v41 = vld [vmem:[#allocation5 + $0x140] sm:$0xff]  }
  0x41   :  { %v1820_v31 = vld [vmem:[#allocation5 + $0x30] sm:$0xff]   ;;  %v1824_v36 = vld [vmem:[#allocation5 + $0x38] sm:$0xff]   ;;  %v1828_v42 = vld [vmem:[#allocation5 + $0x1c0] sm:$0xff]  }
  0x42   :  { %1701 = vmatpush3.bf16.msra.mxu0 %v1804_v10  ;;  %v1821_v32 = vld [vmem:[#allocation5 + $0xb0] sm:$0xff]   ;;  %v1825_v37 = vld [vmem:[#allocation5 + $0xb8] sm:$0xff]   ;;  %v1829_v48 = vld [vmem:[#allocation5 + $0x100] sm:$0xff]  }
  0x43   :  { %1723 = vmatpush3.bf16.msra.mxu1 %v1805_v11  ;;  %1702 = vmatprep.subr.bf16.mxu0 %v1806_v12  ;;  %v2067_v38 = vld [vmem:[#allocation2] sm:$0xff]  ;;  %v1831_v50 = vld [vmem:[#allocation5 + $0x148] sm:$0xff]   ;;  %v1830_v52 = vld [vmem:[#allocation5 + $0x180] sm:$0xff]  }
  0x44   :  { %1724 = vmatprep.subr.bf16.mxu1 %v1807_v13  ;;  %v72_v39 = vrot.slane %v2067_v38, %v2065_v35  ;;  %v65_v40 = vcombine.high %v2067_v38, %v2067_v38  ;;  %v1832_v53 = vld [vmem:[#allocation5 + $0x1c8] sm:$0xff]   ;;  %v1835_v55 = vld [vmem:[#allocation5 + $0x150] sm:$0xff]   ;;  %v1839_v59 = vld [vmem:[#allocation5 + $0x158] sm:$0xff]  }
  0x45   :  { %v1833_v54 = vld [vmem:[#allocation5 + $0x108] sm:$0xff]   ;;  %v1836_v57 = vld [vmem:[#allocation5 + $0x1d0] sm:$0xff]   ;;  %v1840_v61 = vld [vmem:[#allocation5 + $0x1d8] sm:$0xff]  }
  0x46   :  { %1703 = vmatpush3.bf16.msra.mxu0 %v1808_v14  ;;  %v80_v43 = vcombine.high %v72_v39, %v72_v39  ;;  %v79_v44 = vrot.slane %v65_v40, %v2065_v35  ;;  %v107_v45 = vpack.c.bf16 %v72_v39, %v72_v39  ;;  %v1834_v56 = vld [vmem:[#allocation5 + $0x188] sm:$0xff]   ;;  %v1837_v58 = vld [vmem:[#allocation5 + $0x110] sm:$0xff]   ;;  %v1841_v62 = vld [vmem:[#allocation5 + $0x118] sm:$0xff]  }
  0x47   :  { %1725 = vmatpush3.bf16.msra.mxu1 %v1809_v15  ;;  %1704 = vmatprep.subr.bf16.mxu0 %v1810_v16  ;;  %v1838_v60 = vld [vmem:[#allocation5 + $0x190] sm:$0xff]   ;;  %v1843_v63 = vld [vmem:[#allocation5 + $0x160] sm:$0xff]   ;;  %v1842_v0 = vld [vmem:[#allocation5 + $0x198] sm:$0xff]  }
  0x48   :  { %1726 = vmatprep.subr.bf16.mxu1 %v1811_v17  ;;  %v108_v46 = vpack.c.bf16 %v80_v43, %v80_v43  ;;  %v81_v47 = vcombine.high %v79_v44, %v79_v44  ;;  %v109_v49 = vpack.c.bf16 %v79_v44, %v79_v44  ;;  %v1844_v1 = vld [vmem:[#allocation5 + $0x1e0] sm:$0xff]   ;;  %v1847_v3 = vld [vmem:[#allocation5 + $0x168] sm:$0xff]   ;;  %v1851_v7 = vld [vmem:[#allocation5 + $0x170] sm:$0xff]  }
  0x49   :  { %v1845_v2 = vld [vmem:[#allocation5 + $0x120] sm:$0xff]   ;;  %v1848_v5 = vld [vmem:[#allocation5 + $0x1e8] sm:$0xff]   ;;  %v1852_v9 = vld [vmem:[#allocation5 + $0x1f0] sm:$0xff]  }
  0x4a   :  { %1705 = vmatpush3.bf16.msra.mxu0 %v1812_v18  ;;  %666 = vmatprep.mubr.bf16.mxu0 %v108_v46  ;;  %v110_v51 = vpack.c.bf16 %v81_v47, %v81_v47  ;;  %v1846_v4 = vld [vmem:[#allocation5 + $0x1a0] sm:$0xff]   ;;  %v1849_v6 = vld [vmem:[#allocation5 + $0x128] sm:$0xff]   ;;  %v1853_v10 = vld [vmem:[#allocation5 + $0x130] sm:$0xff]  }
  0x4b   :  { %1727 = vmatpush3.bf16.msra.mxu1 %v1813_v19  ;;  %1706 = vmatprep.subr.bf16.mxu0 %v1814_v20  ;;  %v1850_v8 = vld [vmem:[#allocation5 + $0x1a8] sm:$0xff]   ;;  %v1855_v11 = vld [vmem:[#allocation5 + $0x178] sm:$0xff]   ;;  %v1854_v12 = vld [vmem:[#allocation5 + $0x1b0] sm:$0xff]  }
  0x4c   :  { %1728 = vmatprep.subr.bf16.mxu1 %v1815_v21  ;;  %706 = vmatprep.mubr.bf16.mxu1 %v110_v51  ;;  %v1856_v13 = vld [vmem:[#allocation5 + $0x1f8] sm:$0xff]   ;;  %v805_v40 = vld [vmem:[#allocation7 + $0x48] sm:$0xff]  ;;  %v816_v44 = vld [vmem:[#allocation7 + $0xa0] sm:$0xff] }
  0x4d   :  { %v2074_v14 = vld [vmem:[#allocation2 + $0x8] sm:$0xff]  ;;  %v817_v46 = vld [vmem:[#allocation7 + $0xa8] sm:$0xff]  ;;  %v820_v51 = vld [vmem:[#allocation7 + $0xc0] sm:$0xff] }
  0x4e   :  { %1707 = vmatpush3.bf16.msra.mxu0 %v1816_v25  ;;  %v1857_v15 = vld [vmem:[#allocation5 + $0x138] sm:$0xff]   ;;  %v89_v16 = vrot.slane %v2074_v14, %v2065_v35  ;;  %v82_v17 = vcombine.high %v2074_v14, %v2074_v14 }
  0x4f   :  { %1729 = vmatpush3.bf16.msra.mxu1 %v1817_v26  ;;  %1708 = vmatprep.subr.bf16.mxu0 %v1818_v27  ;;  %v1858_v18 = vld [vmem:[#allocation5 + $0x1b8] sm:$0xff]   ;;  %v796_v26 = vld [vmem:[#allocation7] sm:$0xff] }
  0x50   :  { %1730 = vmatprep.subr.bf16.mxu1 %v1819_v28  ;;  %v97_v19 = vcombine.high %v89_v16, %v89_v16  ;;  %v96_v20 = vrot.slane %v82_v17, %v2065_v35  ;;  %v111_v21 = vpack.c.bf16 %v89_v16, %v89_v16  ;;  %v800_v27 = vld [vmem:[#allocation7 + $0x20] sm:$0xff]  ;;  %v797_v28 = vld [vmem:[#allocation7 + $0x8] sm:$0xff] }
  0x51   :  { %v1624_v29 = vcombine.low %v796_v26, %v800_v27  ;;  %v845_v16 = vld [vmem:[#allocation7 + $0x188] sm:$0xff] }
  0x52   :  { %1709 = vmatpush3.bf16.msra.mxu0 %v1820_v31  ;;  %v112_v22 = vpack.c.bf16 %v97_v19, %v97_v19  ;;  %v98_v23 = vcombine.high %v96_v20, %v96_v20  ;;  %v113_v24 = vpack.c.bf16 %v96_v20, %v96_v20  ;;  %v1625_v31 = vcombine.high %v796_v26, %v800_v27  ;;  %v857_v26 = vld [vmem:[#allocation7 + $0x1e8] sm:$0xff] }
  0x53   :  { %1731 = vmatpush3.bf16.msra.mxu1 %v1821_v32  ;;  %1710 = vmatprep.subr.bf16.mxu0 %v1822_v33  ;;  %v801_v32 = vld [vmem:[#allocation7 + $0x28] sm:$0xff]  ;;  %v804_v33 = vld [vmem:[#allocation7 + $0x40] sm:$0xff] }
  0x54   :  { %1732 = vmatprep.subr.bf16.mxu1 %v1823_v34  ;;  %v114_v25 = vpack.c.bf16 %v98_v23, %v98_v23  ;;  %v808_v34 = vld [vmem:[#allocation7 + $0x60] sm:$0xff] }
  0x55   :  { %v1633_v39 = vcombine.high %v804_v33, %v808_v34  ;;  %v1632_v47 = vcombine.low %v804_v33, %v808_v34  ;;  %v856_v23 = vld [vmem:[#allocation7 + $0x1e0] sm:$0xff]  ;;  %v799_v33 = vld [vmem:[#allocation7 + $0x18] sm:$0xff]  ;;  %v1994_v34 = vmov 0  }
  0x56   :  { %1711 = vmatpush3.bf16.msra.mxu0 %v1824_v36  ;;  %v1626_v36 = vcombine.low %v797_v28, %v801_v32 }
  0x57   :  { %1733 = vmatpush3.bf16.msra.mxu1 %v1825_v37  ;;  %1740 = vmatprep.subr.bf16.mxu0 %v1827_v41  ;;  %v1627_v37 = vcombine.high %v797_v28, %v801_v32  ;;  %v809_v41 = vld [vmem:[#allocation7 + $0x68] sm:$0xff]  ;;  %v802_v32 = vld [vmem:[#allocation7 + $0x30] sm:$0xff] }
  0x58   :  { %1762 = vmatprep.subr.bf16.mxu1 %v1828_v42  ;;  %v812_v42 = vld [vmem:[#allocation7 + $0x80] sm:$0xff]  ;;  %v1635_v43 = vcombine.high %v805_v40, %v809_v41 }
  0x59   :  { %667 = vmatmul.mubr.bf16.vlgmr.msra.gmra.mrb[0].mxu0 %v107_v45  ;;  %v813_v45 = vld [vmem:[#allocation7 + $0x88] sm:$0xff] }
  0x5a   :  { %1741 = vmatpush3.bf16.msra.mxu0 %v1829_v48  ;;  %707 = vmatmul.mubr.bf16.vlgmr.msra.gmra.mrb[0].mxu1 %v109_v49  ;;  %v1634_v48 = vcombine.low %v805_v40, %v809_v41  ;;  %v1641_v49 = vcombine.high %v812_v42, %v816_v44 }
  0x5b   :  { %1742 = vmatprep.subr.bf16.mxu0 %v1831_v50  ;;  %1763 = vmatpush3.bf16.msra.mxu1 %v1830_v52  ;;  %v1643_v50 = vcombine.high %v813_v45, %v817_v46  ;;  %v824_v52 = vld [vmem:[#allocation7 + $0xe0] sm:$0xff] }
  0x5c   :  { %1764 = vmatprep.subr.bf16.mxu1 %v1832_v53  ;;  %746 = vmatprep.mubr.bf16.mxu0 %v112_v22  ;;  %v821_v53 = vld [vmem:[#allocation7 + $0xc8] sm:$0xff]  ;;  %v852_v22 = vld [vmem:[#allocation7 + $0x1c0] sm:$0xff] }
  0x5d   :  { %786 = vmatprep.mubr.bf16.mxu1 %v114_v25  ;;  %v1681_v25 = vcombine.high %v852_v22, %v856_v23  ;;  %v1680_v27 = vcombine.low %v852_v22, %v856_v23  ;;  %v823_v22 = vld [vmem:[#allocation7 + $0xd8] sm:$0xff] }
  0x5e   :  { %1743 = vmatpush3.bf16.msra.mxu0 %v1833_v54  ;;  %v825_v54 = vld [vmem:[#allocation7 + $0xe8] sm:$0xff]  ;;  %v827_v23 = vld [vmem:[#allocation7 + $0xf8] sm:$0xff] }
  0x5f   :  { %1744 = vmatprep.subr.bf16.mxu0 %v1835_v55  ;;  %1765 = vmatpush3.bf16.msra.mxu1 %v1834_v56  ;;  %v1640_v55 = vcombine.low %v812_v42, %v816_v44  ;;  %v1642_v56 = vcombine.low %v813_v45, %v817_v46 }
  0x60   :  { %1766 = vmatprep.subr.bf16.mxu1 %v1836_v57  ;;  %v1649_v57 = vcombine.high %v820_v51, %v824_v52 }
  0x62   :  { %1745 = vmatpush3.bf16.msra.mxu0 %v1837_v58  ;;  %v1651_v58 = vcombine.high %v821_v53, %v825_v54 }
  0x63   :  { %1746 = vmatprep.subr.bf16.mxu0 %v1839_v59  ;;  %1767 = vmatpush3.bf16.msra.mxu1 %v1838_v60  ;;  %v828_v59 = vld [vmem:[#allocation7 + $0x100] sm:$0xff] }
  0x64   :  { %1768 = vmatprep.subr.bf16.mxu1 %v1840_v61  ;;  %v832_v60 = vld [vmem:[#allocation7 + $0x120] sm:$0xff]  ;;  %v829_v61 = vld [vmem:[#allocation7 + $0x108] sm:$0xff] }
  0x66   :  { %1747 = vmatpush3.bf16.msra.mxu0 %v1841_v62  ;;  %v833_v62 = vld [vmem:[#allocation7 + $0x128] sm:$0xff] }
  0x67   :  { %1748 = vmatprep.subr.bf16.mxu0 %v1843_v63  ;;  %1769 = vmatpush3.bf16.msra.mxu1 %v1842_v0  ;;  %v1648_v63 = vcombine.low %v820_v51, %v824_v52  ;;  %v1650_v0 = vcombine.low %v821_v53, %v825_v54 }
  0x68   :  { %1770 = vmatprep.subr.bf16.mxu1 %v1844_v1  ;;  %v1657_v1 = vcombine.high %v828_v59, %v832_v60 }
  0x6a   :  { %1749 = vmatpush3.bf16.msra.mxu0 %v1845_v2  ;;  %v1659_v2 = vcombine.high %v829_v61, %v833_v62 }
  0x6b   :  { %1750 = vmatprep.subr.bf16.mxu0 %v1847_v3  ;;  %1771 = vmatpush3.bf16.msra.mxu1 %v1846_v4  ;;  %v836_v3 = vld [vmem:[#allocation7 + $0x140] sm:$0xff] }
  0x6c   :  { %1772 = vmatprep.subr.bf16.mxu1 %v1848_v5  ;;  %v840_v4 = vld [vmem:[#allocation7 + $0x160] sm:$0xff]  ;;  %v837_v5 = vld [vmem:[#allocation7 + $0x148] sm:$0xff] }
  0x6e   :  { %1751 = vmatpush3.bf16.msra.mxu0 %v1849_v6  ;;  %v841_v6 = vld [vmem:[#allocation7 + $0x168] sm:$0xff] }
  0x6f   :  { %1752 = vmatprep.subr.bf16.mxu0 %v1851_v7  ;;  %1773 = vmatpush3.bf16.msra.mxu1 %v1850_v8  ;;  %v1656_v7 = vcombine.low %v828_v59, %v832_v60  ;;  %v1658_v8 = vcombine.low %v829_v61, %v833_v62 }
  0x70   :  { %1774 = vmatprep.subr.bf16.mxu1 %v1852_v9  ;;  %v1665_v9 = vcombine.high %v836_v3, %v840_v4 }
  0x72   :  { %1753 = vmatpush3.bf16.msra.mxu0 %v1853_v10  ;;  %v1667_v10 = vcombine.high %v837_v5, %v841_v6 }
  0x73   :  { %1754 = vmatprep.subr.bf16.mxu0 %v1855_v11  ;;  %1775 = vmatpush3.bf16.msra.mxu1 %v1854_v12  ;;  %v1664_v11 = vcombine.low %v836_v3, %v840_v4  ;;  %v1666_v12 = vcombine.low %v837_v5, %v841_v6  ;;  %v806_v3 = vld [vmem:[#allocation7 + $0x50] sm:$0xff]  ;;  %v807_v5 = vld [vmem:[#allocation7 + $0x58] sm:$0xff] }
  0x74   :  { %1776 = vmatprep.subr.bf16.mxu1 %v1856_v13  ;;  %v844_v13 = vld [vmem:[#allocation7 + $0x180] sm:$0xff]  ;;  %v810_v4 = vld [vmem:[#allocation7 + $0x70] sm:$0xff]  ;;  %v811_v6 = vld [vmem:[#allocation7 + $0x78] sm:$0xff] }
  0x76   :  { %1755 = vmatpush3.bf16.msra.mxu0 %v1857_v15  ;;  %v848_v15 = vld [vmem:[#allocation7 + $0x1a0] sm:$0xff] }
  0x77   :  { %1777 = vmatpush3.bf16.msra.mxu1 %v1858_v18  ;;  %1222 = vmatprep.subr.bf16.mxu0 %v1625_v31  ;;  %v1673_v17 = vcombine.high %v844_v13, %v848_v15  ;;  %v849_v18 = vld [vmem:[#allocation7 + $0x1a8] sm:$0xff]  ;;  %v1672_v19 = vcombine.low %v844_v13, %v848_v15  ;;  %v798_v31 = vld [vmem:[#allocation7 + $0x10] sm:$0xff]  ;;  %v815_v13 = vld [vmem:[#allocation7 + $0x98] sm:$0xff] }
  0x78   :  { %1263 = vmatprep.subr.bf16.mxu1 %v1627_v37  ;;  %v1674_v20 = vcombine.low %v845_v16, %v849_v18  ;;  %v1629_v37 = vcombine.high %v798_v31, %v802_v32  ;;  %v819_v15 = vld [vmem:[#allocation7 + $0xb8] sm:$0xff] }
  0x79   :  { %747 = vmatmul.mubr.bf16.vlgmr.msra.gmra.mrb[4].mxu0 %v111_v21  ;;  %v1675_v21 = vcombine.high %v845_v16, %v849_v18  ;;  %v1636_v16 = vcombine.low %v806_v3, %v810_v4 }
  0x7a   :  { %787 = vmatmul.mubr.bf16.vlgmr.msra.gmra.mrb[4].mxu1 %v113_v24  ;;  %1223 = vmatpush1.bf16.msra.mxu0 %v1624_v29  ;;  %v853_v24 = vld [vmem:[#allocation7 + $0x1c8] sm:$0xff] }
  0x7b   :  { %1264 = vmatpush1.bf16.msra.mxu1 %v1626_v36  ;;  %1224 = vmatprep.subr.bf16.mxu0 %v1633_v39  ;;  %v1682_v28 = vcombine.low %v853_v24, %v857_v26  ;;  %v1683_v29 = vcombine.high %v853_v24, %v857_v26  ;;  %v1628_v36 = vcombine.low %v798_v31, %v802_v32  ;;  %v803_v39 = vld [vmem:[#allocation7 + $0x38] sm:$0xff] }
  0x7c   :  { %1265 = vmatprep.subr.bf16.mxu1 %v1635_v43  ;;  %1254 = vmatprep.mubr.bf16.mxu0 %v1994_v34  ;;  %v1630_v40 = vcombine.low %v799_v33, %v803_v39  ;;  %v1631_v41 = vcombine.high %v799_v33, %v803_v39  ;;  %v1559_v43 = vld [vmem:[%s2133_s2] ss:$0 sm:$0xff]  ;;  %v831_v31 = vld [vmem:[#allocation7 + $0x118] sm:$0xff] }
  0x7d   :  { %1295 = vmatprep.mubr.bf16.mxu1 %v1994_v34  ;;  %v835_v32 = vld [vmem:[#allocation7 + $0x138] sm:$0xff]  ;;  %v838_v39 = vld [vmem:[#allocation7 + $0x150] sm:$0xff] }
  0x7e   :  { %1225 = vmatpush1.bf16.msra.mxu0 %v1632_v47 }
  0x7f   :  { %1266 = vmatpush1.bf16.msra.mxu1 %v1634_v48  ;;  %1226 = vmatprep.subr.bf16.mxu0 %v1641_v49 }
  0x80   :  { %1267 = vmatprep.subr.bf16.mxu1 %v1643_v50 }
  0x82   :  { %1227 = vmatpush1.bf16.msra.mxu0 %v1640_v55 }
  0x83   :  { %1268 = vmatpush1.bf16.msra.mxu1 %v1642_v56  ;;  %1228 = vmatprep.subr.bf16.mxu0 %v1649_v57 }
  0x84   :  { %1269 = vmatprep.subr.bf16.mxu1 %v1651_v58 }
  0x86   :  { %1229 = vmatpush1.bf16.msra.mxu0 %v1648_v63 }
  0x87   :  { %1270 = vmatpush1.bf16.msra.mxu1 %v1650_v0  ;;  %1230 = vmatprep.subr.bf16.mxu0 %v1657_v1 }
  0x88   :  { %1271 = vmatprep.subr.bf16.mxu1 %v1659_v2 }
  0x8a   :  { %1231 = vmatpush1.bf16.msra.mxu0 %v1656_v7 }
  0x8b   :  { %1272 = vmatpush1.bf16.msra.mxu1 %v1658_v8  ;;  %1232 = vmatprep.subr.bf16.mxu0 %v1665_v9  ;;  %v1637_v9 = vcombine.high %v806_v3, %v810_v4  ;;  %v860_v3 = vld [vmem:[%s2135_s4] sm:$0xff]  ;;  %v868_v4 = vsub.s32 1, %v2062_v30  ;;  %s1995_s4 = smov [#allocation8]  }
  0x8c   :  { %1273 = vmatprep.subr.bf16.mxu1 %v1667_v10  ;;  %v1639_v10 = vcombine.high %v807_v5, %v811_v6  ;;  %s1549_s8 = sshll.u32 %s1995_s4, 4  ;;  %s1550_s8 = int_to_ptr.vmem [resolvable:$true] %s1549_s8 }
  0x8d   :  { %s1958_s9 = scalar_lea.vmem %s1550_s8, 1024  ;;  %p1963_p11 = scmp.lt.s32.totalorder %s1550_s8, %s1550_s8 }
  0x8e   :  { %1233 = vmatpush1.bf16.msra.mxu0 %v1664_v11  ;;  %v814_v11 = vld [vmem:[#allocation7 + $0x90] sm:$0xff]  ;;  %p1959_p10 = scmp.ne.s32.totalorder %s1550_s8, %s1958_s9  ;;  %p1964_p12 = scmp.lt.s32.totalorder %s1958_s9, %s1958_s9 }
  0x8f   :  { %1274 = vmatpush1.bf16.msra.mxu1 %v1666_v12  ;;  %1234 = vmatprep.subr.bf16.mxu0 %v1673_v17  ;;  %v818_v12 = vld [vmem:[#allocation7 + $0xb0] sm:$0xff]  ;;  %v1638_v17 = vcombine.low %v807_v5, %v811_v6  ;;  %v876_v5 = vsub.s32 3, %v2062_v30 }
  0x90   :  { %1275 = vmatprep.subr.bf16.mxu1 %v1675_v21  ;;  %v1645_v18 = vcombine.high %v814_v11, %v818_v12  ;;  %v826_v21 = vld [vmem:[#allocation7 + $0xf0] sm:$0xff]  ;;  %v1644_v24 = vcombine.low %v814_v11, %v818_v12  ;;  %p1965_p13 = por %p1964_p12, %p1963_p11 }
  0x92   :  { %1235 = vmatpush1.bf16.msra.mxu0 %v1672_v19  ;;  %v1647_v19 = vcombine.high %v815_v13, %v819_v15  ;;  %p1966_p0 = pnand %p1965_p13, %p1959_p10 }
  0x93   :  { %1276 = vmatpush1.bf16.msra.mxu1 %v1674_v20  ;;  %1236 = vmatprep.subr.bf16.mxu0 %v1681_v25  ;;  %v822_v20 = vld [vmem:[#allocation7 + $0xd0] sm:$0xff]  ;;  %v1646_v25 = vcombine.low %v815_v13, %v819_v15 }
  0x94   :  { %1277 = vmatprep.subr.bf16.mxu1 %v1683_v29  ;;  %v1653_v26 = vcombine.high %v822_v20, %v826_v21  ;;  %v834_v29 = vld [vmem:[#allocation7 + $0x130] sm:$0xff]  ;;  %v1652_v33 = vcombine.low %v822_v20, %v826_v21 }
  0x96   :  { %1237 = vmatpush1.bf16.msra.mxu0 %v1680_v27  ;;  %v1655_v27 = vcombine.high %v823_v22, %v827_v23 }
  0x97   :  { %1278 = vmatpush1.bf16.msra.mxu1 %v1682_v28  ;;  %1304 = vmatprep.subr.bf16.mxu0 %v1629_v37  ;;  %v830_v28 = vld [vmem:[#allocation7 + $0x110] sm:$0xff] }
  0x98   :  { %1345 = vmatprep.subr.bf16.mxu1 %v1631_v41  ;;  %v1661_v37 = vcombine.high %v830_v28, %v834_v29  ;;  %v839_v41 = vld [vmem:[#allocation7 + $0x158] sm:$0xff] }
 0x12c   :  { %v1712_v42 = vpop.f32.mrb[0].mxu0 }
 0x12d   :  { %v1713_v44 = vpop.f32.mrb[1].mxu0  ;;  %v1734_v45 = vpop.f32.mrb[0].mxu1 }
 0x12e   :  { %v1714_v46 = vadd.f32 %v1713_v44, %v1712_v42  ;;  %v1715_v47 = vpop.f32.mrb[2].mxu0  ;;  %v1735_v48 = vpop.f32.mrb[1].mxu1  ;;  %v843_v42 = vld [vmem:[#allocation7 + $0x178] sm:$0xff]  ;;  %v1662_v44 = vcombine.low %v831_v31, %v835_v32 }
 0x12f   :  { %v1716_v49 = vpop.f32.mrb[3].mxu0  ;;  %v1736_v51 = vadd.f32 %v1735_v48, %v1734_v45  ;;  %v1737_v52 = vpop.f32.mrb[2].mxu1  ;;  %v846_v47 = vld [vmem:[#allocation7 + $0x190] sm:$0xff] }
 0x130   :  { %v669_v50 = vadd.f32 %v1714_v46, %v1559_v43  ;;  %v1738_v53 = vpop.f32.mrb[3].mxu1  ;;  %v1660_v43 = vcombine.low %v830_v28, %v834_v29  ;;  %v1671_v46 = vcombine.high %v839_v41, %v843_v42  ;;  %v850_v48 = vld [vmem:[#allocation7 + $0x1b0] sm:$0xff]  ;;  %v847_v49 = vld [vmem:[#allocation7 + $0x198] sm:$0xff]  ;;  %v1670_v52 = vcombine.low %v839_v41, %v843_v42 }
 0x131   :  { %v1677_v53 = vcombine.high %v846_v47, %v850_v48  ;;  %v892_v41 = vsub.s32 7, %v2062_v30 }
 0x132   :  { %v709_v54 = vadd.f32 %v1736_v51, %v669_v50  ;;  %v851_v50 = vld [vmem:[#allocation7 + $0x1b8] sm:$0xff] }
 0x14c   :  { %v1756_v55 = vpop.f32.mrb[4].mxu0 }
 0x14d   :  { %v1757_v56 = vpop.f32.mrb[5].mxu0  ;;  %v1778_v57 = vpop.f32.mrb[4].mxu1 }
 0x14e   :  { %v1758_v58 = vadd.f32 %v1757_v56, %v1756_v55  ;;  %v1759_v59 = vpop.f32.mrb[6].mxu0  ;;  %v1779_v60 = vpop.f32.mrb[5].mxu1  ;;  %v854_v55 = vld [vmem:[#allocation7 + $0x1d0] sm:$0xff] }
 0x14f   :  { %v1760_v61 = vpop.f32.mrb[7].mxu0  ;;  %v1780_v63 = vadd.f32 %v1779_v60, %v1778_v57  ;;  %v1781_v0 = vpop.f32.mrb[6].mxu1  ;;  %v858_v56 = vld [vmem:[#allocation7 + $0x1f0] sm:$0xff]  ;;  %v855_v57 = vld [vmem:[#allocation7 + $0x1d8] sm:$0xff]  ;;  %v1676_v59 = vcombine.low %v846_v47, %v850_v48  ;;  %v1678_v60 = vcombine.low %v847_v49, %v851_v50  ;;  %v893_v48 = vrot.slane %v860_v3, %v892_v41 }
 0x150   :  { %v749_v62 = vadd.f32 %v1758_v58, %v709_v54  ;;  %v1782_v1 = vpop.f32.mrb[7].mxu1  ;;  %v1679_v54 = vcombine.high %v847_v49, %v851_v50  ;;  %v859_v58 = vld [vmem:[#allocation7 + $0x1f8] sm:$0xff]  ;;  %v1685_v61 = vcombine.high %v854_v55, %v858_v56 }
 0x151   :  { %v1686_v0 = vcombine.low %v855_v57, %v859_v58  ;;  %v864_v1 = vsub.s32 0, %v2062_v30 }
 0x152   :  { %v789_v2 = vadd.f32 %v1780_v63, %v749_v62  ;;  %v1687_v62 = vcombine.high %v855_v57, %v859_v58  ;;  %v1684_v63 = vcombine.low %v854_v55, %v858_v56 }
 0x153   :  { %v865_v6 = vrot.slane %v860_v3, %v864_v1 }
 0x154   :  { %v794_v7 = vmax.f32 %v789_v2, 0.0  ;;  %v872_v2 = vsub.s32 2, %v2062_v30 }
 0x156   :  { %v2084_v8 = vpack.c.bf16 %v794_v7, %v794_v7  ;;  %v873_v7 = vrot.slane %v860_v3, %v872_v2 }
 0x158   :  { %1255 = vmatmul.mubr.bf16.vlgmr.msra.gmra.mrb[8].mxu0 %v2084_v8  ;;  %1296 = vmatmul.mubr.bf16.vlgmr.msra.gmra.mrb[8].mxu1 %v2084_v8 }
 0x159   :  { %1305 = vmatpush1.bf16.msra.mxu0 %v1628_v36  ;;  %1346 = vmatpush1.bf16.msra.mxu1 %v1630_v40  ;;  %v1654_v36 = vcombine.low %v823_v22, %v827_v23  ;;  %v842_v40 = vld [vmem:[#allocation7 + $0x170] sm:$0xff] }
 0x15a   :  { %1306 = vmatprep.subr.bf16.mxu0 %v1637_v9  ;;  %1347 = vmatprep.subr.bf16.mxu1 %v1639_v10  ;;  %v1669_v45 = vcombine.high %v838_v39, %v842_v40  ;;  %v1668_v51 = vcombine.low %v838_v39, %v842_v40  ;;  %v869_v9 = vrot.slane %v860_v3, %v868_v4  ;;  %v888_v39 = vsub.s32 6, %v2062_v30 }
 0x15b   :  { %1336 = vmatprep.mubr.bf16.mxu0 %v1994_v34  ;;  %1377 = vmatprep.mubr.bf16.mxu1 %v1994_v34  ;;  %v1663_v34 = vcombine.high %v831_v31, %v835_v32  ;;  %v877_v10 = vrot.slane %v860_v3, %v876_v5  ;;  %v884_v40 = vsub.s32 5, %v2062_v30 }
 0x15d   :  { %1307 = vmatpush1.bf16.msra.mxu0 %v1636_v16  ;;  %1348 = vmatpush1.bf16.msra.mxu1 %v1638_v17  ;;  %v885_v47 = vrot.slane %v860_v3, %v884_v40 }
 0x15e   :  { %1308 = vmatprep.subr.bf16.mxu0 %v1645_v18  ;;  %1349 = vmatprep.subr.bf16.mxu1 %v1647_v19 }
 0x161   :  { %1309 = vmatpush1.bf16.msra.mxu0 %v1644_v24  ;;  %1350 = vmatpush1.bf16.msra.mxu1 %v1646_v25 }
 0x162   :  { %1310 = vmatprep.subr.bf16.mxu0 %v1653_v26  ;;  %1351 = vmatprep.subr.bf16.mxu1 %v1655_v27 }
 0x165   :  { %1311 = vmatpush1.bf16.msra.mxu0 %v1652_v33  ;;  %1352 = vmatpush1.bf16.msra.mxu1 %v1654_v36 }
 0x166   :  { %1312 = vmatprep.subr.bf16.mxu0 %v1661_v37  ;;  %1353 = vmatprep.subr.bf16.mxu1 %v1663_v34  ;;  %v880_v34 = vsub.s32 4, %v2062_v30 }
 0x169   :  { %1313 = vmatpush1.bf16.msra.mxu0 %v1660_v43  ;;  %1354 = vmatpush1.bf16.msra.mxu1 %v1662_v44  ;;  %v881_v44 = vrot.slane %v860_v3, %v880_v34 }
 0x16a   :  { %1314 = vmatprep.subr.bf16.mxu0 %v1669_v45  ;;  %1355 = vmatprep.subr.bf16.mxu1 %v1671_v46  ;;  %v889_v45 = vrot.slane %v860_v3, %v888_v39 }
 0x16d   :  { %1315 = vmatpush1.bf16.msra.mxu0 %v1668_v51  ;;  %1356 = vmatpush1.bf16.msra.mxu1 %v1670_v52 }
 0x16e   :  { %1316 = vmatprep.subr.bf16.mxu0 %v1677_v53  ;;  %1357 = vmatprep.subr.bf16.mxu1 %v1679_v54 }
 0x171   :  { %1317 = vmatpush1.bf16.msra.mxu0 %v1676_v59  ;;  %1358 = vmatpush1.bf16.msra.mxu1 %v1678_v60 }
 0x172   :  { %1318 = vmatprep.subr.bf16.mxu0 %v1685_v61  ;;  %1359 = vmatprep.subr.bf16.mxu1 %v1687_v62 }
 0x175   :  { %1319 = vmatpush1.bf16.msra.mxu0 %v1684_v63  ;;  %1360 = vmatpush1.bf16.msra.mxu1 %v1686_v0 }
 0x178   :  { %1337 = vmatmul.mubr.bf16.vlgmr.msra.gmra.mrb[12].mxu0 %v2084_v8  ;;  %1378 = vmatmul.mubr.bf16.vlgmr.msra.gmra.mrb[12].mxu1 %v2084_v8 }
 0x22b   :  { %v1256_v11 = vpop.f32.mrb[8].mxu0  ;;  %v1297_v12 = vpop.f32.mrb[8].mxu1 }
 0x22c   :  { %v1257_v13 = vadd.f32 %v1256_v11, %v865_v6  ;;  %v1298_v8 = vadd.f32 %v1297_v12, %v873_v7  ;;  %v1258_v15 = vpop.f32.mrb[9].mxu0  ;;  %v1299_v16 = vpop.f32.mrb[9].mxu1 }
 0x22d   :  { %v1259_v17 = vadd.f32 %v1258_v15, %v869_v9  ;;  %v1300_v18 = vadd.f32 %v1299_v16, %v877_v10  ;;  %v1260_v19 = vpop.f32.mrb[10].mxu0  ;;  %v1301_v20 = vpop.f32.mrb[10].mxu1 }
 0x22e   :  { %v1688_v21 = vmul.f32 -1.442695, %v1257_v13  ;;  %v1690_v22 = vmul.f32 -1.442695, %v1298_v8  ;;  %v1261_v23 = vpop.f32.mrb[11].mxu0  ;;  %v1302_v24 = vpop.f32.mrb[11].mxu1 }
 0x22f   :  { %v1689_v25 = vmul.f32 -1.442695, %v1259_v17  ;;  %v1691_v26 = vmul.f32 -1.442695, %v1300_v18 }
 0x230   :  { %1860 = vpow2.f32 %v1688_v21 }
 0x231   :  { %1862 = vpow2.f32 %v1690_v22 }
 0x232   :  { %1864 = vpow2.f32 %v1689_v25 }
 0x233   :  { %1866 = vpow2.f32 %v1691_v26 }
 0x23a   :  { %v1861_v27 = vpop.eup %1860 }
 0x23b   :  { %v1863_v28 = vpop.eup %1862  ;;  %v1410_v29 = vadd.f32 1.0, %v1861_v27 }
 0x23c   :  { %v1865_v31 = vpop.eup %1864  ;;  %v1412_v32 = vadd.f32 1.0, %v1863_v28 }
 0x23d   :  { %v1867_v33 = vpop.eup %1866  ;;  %1868 = vrcp.f32 %v1410_v29  ;;  %v1411_v36 = vadd.f32 1.0, %v1865_v31 }
 0x23e   :  { %1870 = vrcp.f32 %v1412_v32  ;;  %v1413_v37 = vadd.f32 1.0, %v1867_v33 }
 0x23f   :  { %1872 = vrcp.f32 %v1411_v36 }
 0x240   :  { %1874 = vrcp.f32 %v1413_v37 }
 0x247   :  { %v1869_v42 = vpop.eup %1868 }
 0x248   :  { %v1871_v43 = vpop.eup %1870 }
 0x249   :  { %v1873_v46 = vpop.eup %1872 }
 0x24a   :  { %v1875_v49 = vpop.eup %1874  ;;  %v1442_v50 = vcombine.low %v1869_v42, %v1873_v46 }
 0x24b   :  { %v1443_v51 = vcombine.low %v1871_v43, %v1875_v49  ;;  %v1338_v52 = vpop.f32.mrb[12].mxu0  ;;  %v1379_v53 = vpop.f32.mrb[12].mxu1 }
 0x24c   :  { %v1450_v54 = vrot.slane %v1442_v50, %v2065_v35  ;;  %v1339_v55 = vadd.f32 %v1338_v52, %v881_v44  ;;  %v1380_v56 = vadd.f32 %v1379_v53, %v889_v45  ;;  %v1340_v57 = vpop.f32.mrb[13].mxu0  ;;  %v1381_v58 = vpop.f32.mrb[13].mxu1 }
 0x24d   :  { %v1457_v30 = vrot.slane %v1443_v51, %v2065_v35  ;;  %v1341_v59 = vadd.f32 %v1340_v57, %v885_v47  ;;  %v1382_v60 = vadd.f32 %v1381_v58, %v893_v48  ;;  %v1342_v61 = vpop.f32.mrb[14].mxu0  ;;  %v1383_v62 = vpop.f32.mrb[14].mxu1 }
 0x24e   :  { %v1692_v63 = vmul.f32 -1.442695, %v1339_v55  ;;  %v1694_v0 = vmul.f32 -1.442695, %v1380_v56  ;;  %v1343_v1 = vpop.f32.mrb[15].mxu0  ;;  %v1384_v2 = vpop.f32.mrb[15].mxu1 }
 0x24f   :  { %v1458_v3 = vcombine.low %v1450_v54, %v1457_v30  ;;  %v1693_v4 = vmul.f32 -1.442695, %v1341_v59  ;;  %v1695_v5 = vmul.f32 -1.442695, %v1382_v60 }
 0x250   :  { %1876 = vpow2.f32 %v1692_v63 }
 0x251   :  { %v1478_v6 = vsub.f32 %v2067_v38, %v1458_v3  ;;  %1878 = vpow2.f32 %v1694_v0 }
 0x252   :  { %1880 = vpow2.f32 %v1693_v4 }
 0x253   :  { %v1480_v7 = vmul.f32 %v1478_v6, %v1478_v6  ;;  %1882 = vpow2.f32 %v1695_v5 }
 0x255   :  { %v1484_v9 = vcombine.high %v1480_v7, %v1480_v7  ;;  %v1491_v10 = vrot.slane %v1480_v7, %v2065_v35 }
 0x257   :  { %v1498_v11 = vrot.slane %v1484_v9, %v2065_v35  ;;  %v1499_v12 = vcombine.high %v1491_v10, %v1491_v10  ;;  %v1527_v13 = vsel %vm1526_vm0, %v1491_v10, 0.0 }
 0x258   :  { %1535 = vst [vmem:[#allocation8] sm:$0xff] %v1527_v13 }
 0x259   :  { %v1500_v8 = vcombine.high %v1498_v11, %v1498_v11  ;;  %v1528_v15 = vsel %vm1526_vm0, %v1499_v12, 0.0  ;;  %v1529_v16 = vsel %vm1526_vm0, %v1498_v11, 0.0 }
 0x25a   :  { %v1877_v38 = vpop.eup %1876  ;;  %1536 = vst [vmem:[#allocation8 + $0x8] sm:$0xff] %v1528_v15  ;;  %1537 = vst [vmem:[#allocation8 + $0x10] sm:$0xff] %v1529_v16 }
 0x25b   :  { %v1879_v17 = vpop.eup %1878  ;;  %v1414_v18 = vadd.f32 1.0, %v1877_v38  ;;  %v1530_v19 = vsel %vm1526_vm0, %v1500_v8, 0.0 }
 0x25c   :  { %v1881_v20 = vpop.eup %1880  ;;  %v1416_v21 = vadd.f32 1.0, %v1879_v17  ;;  %1538 = vst [vmem:[#allocation8 + $0x18] sm:$0xff] %v1530_v19 }
 0x25d   :  { %v1883_v22 = vpop.eup %1882  ;;  %1884 = vrcp.f32 %v1414_v18  ;;  %v1415_v23 = vadd.f32 1.0, %v1881_v20 }
 0x25e   :  { %1886 = vrcp.f32 %v1416_v21  ;;  %v1417_v24 = vadd.f32 1.0, %v1883_v22 }
 0x25f   :  { %1888 = vrcp.f32 %v1415_v23 }
 0x260   :  { %1890 = vrcp.f32 %v1417_v24 }
 0x267   :  { %v1885_v25 = vpop.eup %1884 }
 0x268   :  { %v1887_v26 = vpop.eup %1886 }
 0x269   :  { %v1889_v27 = vpop.eup %1888 }
 0x26a   :  { %v1891_v28 = vpop.eup %1890  ;;  %v1459_v29 = vcombine.low %v1885_v25, %v1889_v27 }
 0x26b   :  { %v1460_v31 = vcombine.low %v1887_v26, %v1891_v28 }
 0x26c   :  { %v1467_v32 = vrot.slane %v1459_v29, %v2065_v35 }
 0x26d   :  { %v1474_v33 = vrot.slane %v1460_v31, %v2065_v35 }
 0x26f   :  { %v1475_v36 = vcombine.low %v1467_v32, %v1474_v33 }
 0x271   :  { %v1479_v37 = vsub.f32 %v2074_v14, %v1475_v36 }
 0x273   :  { %v1481_v34 = vmul.f32 %v1479_v37, %v1479_v37 }
 0x275   :  { %v1501_v39 = vcombine.high %v1481_v34, %v1481_v34  ;;  %v1508_v40 = vrot.slane %v1481_v34, %v2065_v35 }
 0x277   :  { %v1515_v41 = vrot.slane %v1501_v39, %v2065_v35  ;;  %v1516_v42 = vcombine.high %v1508_v40, %v1508_v40  ;;  %v1531_v43 = vsel %vm1526_vm0, %v1508_v40, 0.0 }
 0x278   :  { %1539 = vst [vmem:[#allocation8 + $0x20] sm:$0xff] %v1531_v43 }
 0x279   :  { %v1517_v44 = vcombine.high %v1515_v41, %v1515_v41  ;;  %v1532_v45 = vsel %vm1526_vm0, %v1516_v42, 0.0  ;;  %v1533_v46 = vsel %vm1526_vm0, %v1515_v41, 0.0 }
 0x27a   :  { %1540 = vst [vmem:[#allocation8 + $0x28] sm:$0xff] %v1532_v45  ;;  %1541 = vst [vmem:[#allocation8 + $0x30] sm:$0xff] %v1533_v46 }
 0x27b   :  { %v1534_v14 = vsel %vm1526_vm0, %v1517_v44, 0.0 }
 0x27c   :  { %1542 = vst [vmem:[#allocation8 + $0x38] sm:$0xff] %v1534_v14 }
 0x27d   :  { %1969 = shalt.err (!%p1966_p0)
}
 0x27e   :  { %s1970_s12 = scalar_lea.hbm %s2136_s5, 1024 }
 0x27f   :  { %p1971_p1 = scmp.ne.s32.totalorder %s2136_s5, %s1970_s12  ;;  %p1974_p2 = scmp.lt.u32.totalorder %s1970_s12, %s2136_s5 }
 0x281   :  { %p1976_p3 = pnand %p1974_p2, %p1971_p1 }
 0x283   :  { %1979 = shalt.err (!%p1976_p3)
}
 0x284   :  { %1552 = dma.vmem_to_hbm [thread:$0]  %s1550_s8, 1024, %s2136_s5, [#allocation4]  }
 0x285   :  { %1984 = dma.done.wait [#allocation4], 1024  }
 0x286   :  { %1985 = vsyncadd [#allocation4], 4294966272 }
 0x287   :  { %1556 = vsyncpa [#allocation3], 1 }
 0x288   :  { %1557 = vsyncpa [#allocation6], 1 }
 0x289   :  { %1558 = vsyncpa [#allocation4], 1 }

</bundles_post_ra>
